<compile_context>
chip_gen: v5e
topology: v5e:2x2
jax: 0.10.0
libtpu: 0.0.40
codegen_flags: <defaults>
</compile_context>

<pallas_src>
import jax
import jax.numpy as jnp
from jax.experimental import pallas as pl
from jax.experimental.pallas import tpu as pltpu


def _round_up(x, m):
    return ((x + m - 1) // m) * m


# --------------------------------------------------------------------------
# Kernel 1: scores[i] = logit_scale * <image_features[i], text_features[0]>
# Streaming row-tiled matvec; O(N*D), never builds the N x N logits matrix.
# --------------------------------------------------------------------------
def scores_kernel(scale_ref, img_ref, txt_ref, s_ref):
    scale = scale_ref[0]
    img = img_ref[...].astype(jnp.float32)            # (TS, D)
    txt = txt_ref[...].astype(jnp.float32)            # (1, D) -- text_features[0]
    s_ref[...] = scale * jnp.sum(img * txt, axis=-1, keepdims=True)   # (TS, 1)


# --------------------------------------------------------------------------
# Kernel 2: tiled pairwise hinge loss over score pairs.
# Padded rows carry y = -inf and padded cols carry y = +inf, so rel is False
# for every padded pair and no explicit index masking is needed.
# --------------------------------------------------------------------------
def pairwise_hinge_kernel(s_row_ref, s_col_ref, y_row_ref, y_col_ref, out_ref):
    # Output block is resident across the col-tile (reduction) axis: init at c == 0.
    @pl.when(pl.program_id(1) == 0)
    def _():
        out_ref[...] = jnp.zeros_like(out_ref)

    s_i = s_row_ref[...]                               # (TR, 1)
    s_j = s_col_ref[...]                               # (1, TC)
    y_i = y_row_ref[...]                               # (TR, 1)
    y_j = y_col_ref[...]                               # (1, TC)

    rel = y_i > y_j                                    # (TR, TC): pair counted iff y_i > y_j
    hinge = jnp.maximum(1.0 - (s_i - s_j), 0.0)        # (TR, TC)
    contrib = jnp.where(rel, hinge, 0.0)

    out_ref[...] += jnp.sum(contrib, axis=0, keepdims=True)   # (1, TC) partial sums


# --------------------------------------------------------------------------
# Wrapper
# --------------------------------------------------------------------------
def clip_direct_rank_loss(image_features, text_features, logit_scale,
                          adapter_targets, *, tile_s=512, tile_r=256, tile_c=2048):
    """Forward pass of ClipDirectRankLoss (single-device). Returns a scalar loss."""
    n, d = image_features.shape

    # ---- kernel 1: streaming row-tiled matvec --------------------------------
    ts = min(tile_s, max(8, _round_up(n, 8)))
    n_pad_s = _round_up(n, ts)
    num_s_tiles = n_pad_s // ts

    img = image_features
    if n_pad_s != n:
        img = jnp.pad(img, ((0, n_pad_s - n), (0, 0)))
    txt0 = text_features[0:1, :]                       # only text embedding 0 is needed
    scale = jnp.asarray(logit_scale, dtype=jnp.float32).reshape((1,))

    scores = pl.pallas_call(
        scores_kernel,
        out_shape=jax.ShapeDtypeStruct((n_pad_s, 1), jnp.float32),
        grid=(num_s_tiles,),
        in_specs=[
            pl.BlockSpec(memory_space=pltpu.MemorySpace.SMEM),    # logit_scale
            pl.BlockSpec((ts, d), lambda i: (i, 0)),              # image feature rows
            pl.BlockSpec((1, d), lambda i: (0, 0)),               # text_features[0]
        ],
        out_specs=pl.BlockSpec((ts, 1), lambda i: (i, 0)),
        compiler_params=pltpu.CompilerParams(dimension_semantics=("parallel",)),
    )(scale, img, txt0)

    s = scores.reshape(-1)[:n]                                     # (n,) valid scores

    # ---- kernel 2: tiled pairwise hinge --------------------------------------
    # >= 2 row tiles whenever possible (v7x megacore balance); cap col tile near n.
    tr = min(tile_r, max(8, _round_up(pl.cdiv(n, 2), 8)))
    tc = min(tile_c, max(128, _round_up(n, 128)))
    n_pad_r = _round_up(n, tr)
    n_pad_c = _round_up(n, tc)
    num_r = n_pad_r // tr
    num_c = n_pad_c // tc

    y = adapter_targets.reshape(-1).astype(jnp.float32)
    # Sentinel padding: -inf rows / +inf cols make rel False for any padded pair.
    s_row = jnp.pad(s, (0, n_pad_r - n)).reshape(n_pad_r, 1)
    s_col = jnp.pad(s, (0, n_pad_c - n)).reshape(1, n_pad_c)
    y_row = jnp.pad(y, (0, n_pad_r - n), constant_values=-jnp.inf).reshape(n_pad_r, 1)
    y_col = jnp.pad(y, (0, n_pad_c - n), constant_values=jnp.inf).reshape(1, n_pad_c)

    partials = pl.pallas_call(
        pairwise_hinge_kernel,
        out_shape=jax.ShapeDtypeStruct((num_r, tc), jnp.float32),
        grid=(num_r, num_c),
        in_specs=[
            pl.BlockSpec((tr, 1), lambda r, c: (r, 0)),            # s rows
            pl.BlockSpec((1, tc), lambda r, c: (0, c)),            # s cols
            pl.BlockSpec((tr, 1), lambda r, c: (r, 0)),            # y rows
            pl.BlockSpec((1, tc), lambda r, c: (0, c)),            # y cols
        ],
        out_specs=pl.BlockSpec((1, tc), lambda r, c: (r, 0)),
        compiler_params=pltpu.CompilerParams(
            dimension_semantics=("parallel", "arbitrary"),
            vmem_limit_bytes=32 * 1024 * 1024),
    )(s_row, s_col, y_row, y_col)

    # PairwiseHingeLoss returns a per-query sum; there is a single query here.
    return jnp.sum(partials)


# --------------------------------------------------------------------------
# Pure-JAX reference (mirrors the torch module, world_size == 1)
# --------------------------------------------------------------------------
def clip_direct_rank_loss_ref(image_features, text_features, logit_scale,
                              adapter_targets):
    logits_per_image = logit_scale * jnp.dot(
        image_features.astype(jnp.float32),
        text_features.astype(jnp.float32).T,
        precision=jax.lax.Precision.HIGHEST)
    s = logits_per_image[:, 0]
    y = adapter_targets.reshape(-1).astype(jnp.float32)
    rel = y[:, None] > y[None, :]
    hinge = jnp.maximum(1.0 - (s[:, None] - s[None, :]), 0.0)
    return jnp.sum(jnp.where(rel, hinge, 0.0))


if __name__ == "__main__":
    key = jax.random.PRNGKey(0)
    k1, k2, k3 = jax.random.split(key, 3)

    # Non-tile-multiple batch so row padding (-inf sentinel), column padding (+inf
    # sentinel) and the 2-row-tile grid are all exercised.
    N, D = 150, 64

    image_features = jax.random.normal(k1, (N, D), dtype=jnp.float32)
    text_features = jax.random.normal(k2, (N, D), dtype=jnp.float32)
    # L2-normalize as CLIP does upstream of the loss.
    image_features = image_features / jnp.linalg.norm(image_features, axis=-1, keepdims=True)
    text_features = text_features / jnp.linalg.norm(text_features, axis=-1, keepdims=True)

    logit_scale = jnp.float32(14.285714)                # ~ exp(2.659), typical learned value
    adapter_targets = jax.random.randint(k3, (N,), 0, 5, dtype=jnp.int32)

    loss = clip_direct_rank_loss(image_features, text_features, logit_scale, adapter_targets)
    jax.block_until_ready(loss)

    ref = clip_direct_rank_loss_ref(image_features, text_features, logit_scale, adapter_targets)
    assert bool(jnp.isfinite(loss)), loss
    assert jnp.allclose(loss, ref, rtol=1e-4, atol=1e-2), (loss, ref)

    print("KERNEL_OK")
</pallas_src>

<mosaic_0001>
module attributes {stable_mosaic.version = 11 : i64} {
  func.func @scores_kernel(%arg0: i32, %arg1: memref<1xf32, #tpu.memory_space<smem>>, %arg2: memref<152x64xf32, #tpu.memory_space<vmem>>, %arg3: memref<1x64xf32, #tpu.memory_space<vmem>>, %arg4: memref<152x1xf32, #tpu.memory_space<vmem>>) attributes {dimension_semantics = [#tpu.dimension_semantics<parallel>], iteration_bounds = array<i64: 1>, scalar_prefetch = 0 : i64, scratch_operands = 0 : i64, tpu.core_type = #tpu.core_type<tc>, window_params = [{transform_indices = @transform_0, window_bounds = array<i64: 1>}, {transform_indices = @transform_1, window_bounds = array<i64: 152, 64>}, {pipeline_mode = #tpu.pipeline_mode<synchronous>, transform_indices = @transform_2, window_bounds = array<i64: 1, 64>}, {transform_indices = @transform_3, window_bounds = array<i64: 152, 1>}]} {
    %c0 = arith.constant 0 : index
    %0 = memref.load %arg1[%c0] : memref<1xf32, #tpu.memory_space<smem>>
    %c0_0 = arith.constant 0 : index
    %c0_1 = arith.constant 0 : index
    %1 = vector.load %arg2[%c0_0, %c0_1] : memref<152x64xf32, #tpu.memory_space<vmem>>, vector<152x64xf32>
    %c0_2 = arith.constant 0 : index
    %c0_3 = arith.constant 0 : index
    %2 = vector.load %arg3[%c0_2, %c0_3] : memref<1x64xf32, #tpu.memory_space<vmem>>, vector<1x64xf32>
    %3 = vector.broadcast %2 : vector<1x64xf32> to vector<152x64xf32>
    %4 = arith.mulf %1, %3 : vector<152x64xf32>
    %cst = arith.constant dense<0.000000e+00> : vector<152xf32>
    %5 = vector.multi_reduction <add>, %4, %cst [1] : vector<152x64xf32> to vector<152xf32>
    %6 = vector.shape_cast %5 : vector<152xf32> to vector<152x1xf32>
    %7 = vector.broadcast %0 : f32 to vector<152x1xf32>
    %8 = arith.mulf %7, %6 : vector<152x1xf32>
    %c0_4 = arith.constant 0 : index
    %c0_5 = arith.constant 0 : index
    %9 = vector.load %arg4[%c0_4, %c0_5] : memref<152x1xf32, #tpu.memory_space<vmem>>, vector<152x1xf32>
    tpu.vector_store %arg4[%c0_4, %c0_5], %8 {strides = array<i32>} : memref<152x1xf32, #tpu.memory_space<vmem>>, vector<152x1xf32>,
    return
  }
  func.func @transform_0(%arg0: i32) -> i32 {
    %c0_i32 = arith.constant 0 : i32
    %c0_i32_0 = arith.constant 0 : i32
    return %c0_i32 : i32
  }
  func.func @transform_1(%arg0: i32) -> (i32, i32) {
    %c0_i32 = arith.constant 0 : i32
    %c0_i32_0 = arith.constant 0 : i32
    return %arg0, %c0_i32 : i32, i32
  }
  func.func @transform_2(%arg0: i32) -> (i32, i32) {
    %c0_i32 = arith.constant 0 : i32
    %c0_i32_0 = arith.constant 0 : i32
    %c0_i32_1 = arith.constant 0 : i32
    return %c0_i32, %c0_i32_0 : i32, i32
  }
  func.func @transform_3(%arg0: i32) -> (i32, i32) {
    %c0_i32 = arith.constant 0 : i32
    %c0_i32_0 = arith.constant 0 : i32
    return %arg0, %c0_i32 : i32, i32
  }
}

</mosaic_0001>

<bundles_post_ra>
// kernel: tpu_custom_call.1
= control target key start
LH: loop header
LB: loop body
LE: loop exit
PB: predicated region body
PF: predicated region fallthrough
CT: control target
= control target key end

     0   :  { %vm58_vm0 = vcmask 523264   ;;  %vm136_vm1 = vcmask 7168   ;;  %s360_s1 = inlined_call_operand.vmem [shape: f32[152,64], index: 1, kind: input, shape index: {}]   ;;  %s361_s2 = inlined_call_operand.vmem [shape: f32[1,64], index: 2, kind: input, shape index: {}]   ;;  %s362_s0 = inlined_call_operand.<no memory space> [shape: f32[1], index: 0, kind: input, shape index: {}]   ;;  %s363_s3 = inlined_call_operand.vmem [shape: f32[152,1], index: 3, kind: output, shape index: {}]  }
   0x1   :  { %v16_v0 = vld [vmem:[%s360_s1] sm:$0xff]  ;;  %v18_v3 = vld [vmem:[%s360_s1 + $0x10] sm:$0xff]  ;;  %v17_v7 = vld [vmem:[%s360_s1 + $0x8] sm:$0xff]  ;;  %v116_v58 = vstv %s362_s0 }
   0x2   :  { %v187_v1 = vld [vmem:[%s361_s2] ss:$0 sm:$0xff]  ;;  %v21_v8 = vld [vmem:[%s360_s1 + $0x28] sm:$0xff]  ;;  %v19_v12 = vld [vmem:[%s360_s1 + $0x18] sm:$0xff] }
   0x3   :  { %v20_v2 = vld [vmem:[%s360_s1 + $0x20] sm:$0xff]  ;;  %v39_v4 = vmul.f32 %v187_v1, %v16_v0  ;;  %v41_v6 = vmul.f32 %v187_v1, %v18_v3  ;;  %v40_v13 = vmul.f32 %v187_v1, %v17_v7  ;;  %v44_v14 = vmul.f32 %v187_v1, %v21_v8  ;;  %v22_v19 = vld [vmem:[%s360_s1 + $0x30] sm:$0xff]  ;;  %v23_v21 = vld [vmem:[%s360_s1 + $0x38] sm:$0xff] }
   0x4   :  { %v43_v5 = vmul.f32 %v187_v1, %v20_v2  ;;  %v42_v15 = vmul.f32 %v187_v1, %v19_v12  ;;  %v24_v20 = vld [vmem:[%s360_s1 + $0x40] sm:$0xff]  ;;  %v45_v22 = vmul.f32 %v187_v1, %v22_v19  ;;  %v46_v24 = vmul.f32 %v187_v1, %v23_v21  ;;  %v25_v28 = vld [vmem:[%s360_s1 + $0x48] sm:$0xff]  ;;  %v27_v29 = vld [vmem:[%s360_s1 + $0x58] sm:$0xff] }
   0x5   :  { %v59_v9 = vsel %vm58_vm0, %v39_v4, 0.0  ;;  %v65_v11 = vsel %vm58_vm0, %v41_v6, 0.0  ;;  %v62_v16 = vsel %vm58_vm0, %v40_v13, 0.0  ;;  %v74_v17 = vsel %vm58_vm0, %v44_v14, 0.0  ;;  %v26_v30 = vld [vmem:[%s360_s1 + $0x50] sm:$0xff]  ;;  %v28_v37 = vld [vmem:[%s360_s1 + $0x60] sm:$0xff] }
   0x6   :  { %v71_v10 = vsel %vm58_vm0, %v43_v5, 0.0  ;;  %60 = vadd.xlane.f32.xlu0 %v59_v9  ;;  %66 = vadd.xlane.f32.xlu1 %v65_v11  ;;  %v68_v18 = vsel %vm58_vm0, %v42_v15, 0.0  ;;  %v47_v23 = vmul.f32 %v187_v1, %v24_v20  ;;  %v77_v25 = vsel %vm58_vm0, %v45_v22, 0.0  ;;  %v30_v38 = vld [vmem:[%s360_s1 + $0x70] sm:$0xff]  ;;  %v29_v39 = vld [vmem:[%s360_s1 + $0x68] sm:$0xff]  ;;  %v31_v46 = vld [vmem:[%s360_s1 + $0x78] sm:$0xff] }
   0x7   :  { %72 = vadd.xlane.f32.xlu2 %v71_v10  ;;  %v80_v27 = vsel %vm58_vm0, %v46_v24, 0.0  ;;  %v48_v31 = vmul.f32 %v187_v1, %v25_v28  ;;  %v50_v32 = vmul.f32 %v187_v1, %v27_v29  ;;  %v49_v33 = vmul.f32 %v187_v1, %v26_v30  ;;  %v33_v47 = vld [vmem:[%s360_s1 + $0x88] sm:$0xff]  ;;  %v32_v48 = vld [vmem:[%s360_s1 + $0x80] sm:$0xff]  ;;  %v34_v55 = vld [vmem:[%s360_s1 + $0x90] sm:$0xff] }
   0x8   :  { %v83_v26 = vsel %vm58_vm0, %v47_v23, 0.0  ;;  %v51_v40 = vmul.f32 %v187_v1, %v28_v37  ;;  %v53_v41 = vmul.f32 %v187_v1, %v30_v38  ;;  %v52_v42 = vmul.f32 %v187_v1, %v29_v39 }
   0x9   :  { %v86_v34 = vsel %vm58_vm0, %v48_v31, 0.0  ;;  %v92_v35 = vsel %vm58_vm0, %v50_v32, 0.0  ;;  %v89_v36 = vsel %vm58_vm0, %v49_v33, 0.0  ;;  %v54_v49 = vmul.f32 %v187_v1, %v31_v46 }
   0xa   :  { %v95_v43 = vsel %vm58_vm0, %v51_v40, 0.0  ;;  %v101_v44 = vsel %vm58_vm0, %v53_v41, 0.0  ;;  %v98_v45 = vsel %vm58_vm0, %v52_v42, 0.0  ;;  %v56_v50 = vmul.f32 %v187_v1, %v33_v47 }
   0xb   :  { %v55_v51 = vmul.f32 %v187_v1, %v32_v48  ;;  %v104_v52 = vsel %vm58_vm0, %v54_v49, 0.0  ;;  %v57_v56 = vmul.f32 %v187_v1, %v34_v55 }
   0xc   :  { %v110_v53 = vsel %vm58_vm0, %v56_v50, 0.0 }
   0xd   :  { %v107_v54 = vsel %vm58_vm0, %v55_v51, 0.0  ;;  %v113_v57 = vsel %vm58_vm0, %v57_v56, 0.0 }
   0xe   :  { %63 = vadd.xlane.f32.xlu0 %v62_v16  ;;  %69 = vadd.xlane.f32.xlu1 %v68_v18 }
   0xf   :  { %75 = vadd.xlane.f32.xlu2 %v74_v17 }
  0x16   :  { %78 = vadd.xlane.f32.xlu0 %v77_v25  ;;  %81 = vadd.xlane.f32.xlu1 %v80_v27 }
  0x17   :  { %84 = vadd.xlane.f32.xlu2 %v83_v26 }
  0x1e   :  { %87 = vadd.xlane.f32.xlu0 %v86_v34  ;;  %90 = vadd.xlane.f32.xlu1 %v89_v36 }
  0x1f   :  { %93 = vadd.xlane.f32.xlu2 %v92_v35 }
  0x26   :  { %96 = vadd.xlane.f32.xlu0 %v95_v43  ;;  %99 = vadd.xlane.f32.xlu1 %v98_v45 }
  0x27   :  { %102 = vadd.xlane.f32.xlu2 %v101_v44 }
  0x2e   :  { %105 = vadd.xlane.f32.xlu0 %v104_v52  ;;  %108 = vadd.xlane.f32.xlu1 %v107_v54 }
  0x2f   :  { %111 = vadd.xlane.f32.xlu2 %v110_v53 }
  0x36   :  { %114 = vadd.xlane.f32.xlu0 %v113_v57 }
  0x79   :  { %v61_v59 = vpop.xlane.xlu0 %60  ;;  %v67_v63 = vpop.xlane.xlu1 %66 }
  0x7a   :  { %v73_v60 = vpop.xlane.xlu2 %72  ;;  %v117_v61 = vmul.f32 %v116_v58, %v61_v59  ;;  %v119_v0 = vmul.f32 %v116_v58, %v67_v63 }
  0x7b   :  { %v121_v62 = vmul.f32 %v116_v58, %v73_v60 }
  0x7c   :  { %137 = vst.msk [vmem:[%s363_s3] sm:$0xff] %vm136_vm1, %v117_v61 }
  0x7d   :  { %141 = vst.msk [vmem:[%s363_s3 + $0x20] sm:$0xff] %vm136_vm1, %v121_v62 }
  0x7e   :  { %139 = vst.msk [vmem:[%s363_s3 + $0x10] sm:$0xff] %vm136_vm1, %v119_v0 }
  0x81   :  { %v64_v1 = vpop.xlane.xlu0 %63  ;;  %v70_v5 = vpop.xlane.xlu1 %69 }
  0x82   :  { %v76_v2 = vpop.xlane.xlu2 %75  ;;  %v118_v3 = vmul.f32 %v116_v58, %v64_v1  ;;  %v120_v6 = vmul.f32 %v116_v58, %v70_v5 }
  0x83   :  { %v122_v4 = vmul.f32 %v116_v58, %v76_v2 }
  0x84   :  { %138 = vst.msk [vmem:[%s363_s3 + $0x8] sm:$0xff] %vm136_vm1, %v118_v3 }
  0x85   :  { %142 = vst.msk [vmem:[%s363_s3 + $0x28] sm:$0xff] %vm136_vm1, %v122_v4 }
  0x86   :  { %140 = vst.msk [vmem:[%s363_s3 + $0x18] sm:$0xff] %vm136_vm1, %v120_v6 }
  0x89   :  { %v79_v7 = vpop.xlane.xlu0 %78  ;;  %v82_v11 = vpop.xlane.xlu1 %81 }
  0x8a   :  { %v85_v8 = vpop.xlane.xlu2 %84  ;;  %v123_v9 = vmul.f32 %v116_v58, %v79_v7  ;;  %v124_v12 = vmul.f32 %v116_v58, %v82_v11 }
  0x8b   :  { %v125_v10 = vmul.f32 %v116_v58, %v85_v8 }
  0x8c   :  { %143 = vst.msk [vmem:[%s363_s3 + $0x30] sm:$0xff] %vm136_vm1, %v123_v9 }
  0x8d   :  { %145 = vst.msk [vmem:[%s363_s3 + $0x40] sm:$0xff] %vm136_vm1, %v125_v10 }
  0x8e   :  { %144 = vst.msk [vmem:[%s363_s3 + $0x38] sm:$0xff] %vm136_vm1, %v124_v12 }
  0x91   :  { %v88_v13 = vpop.xlane.xlu0 %87  ;;  %v91_v17 = vpop.xlane.xlu1 %90 }
  0x92   :  { %v94_v14 = vpop.xlane.xlu2 %93  ;;  %v126_v15 = vmul.f32 %v116_v58, %v88_v13  ;;  %v127_v18 = vmul.f32 %v116_v58, %v91_v17 }
  0x93   :  { %v128_v16 = vmul.f32 %v116_v58, %v94_v14 }
  0x94   :  { %146 = vst.msk [vmem:[%s363_s3 + $0x48] sm:$0xff] %vm136_vm1, %v126_v15 }
  0x95   :  { %148 = vst.msk [vmem:[%s363_s3 + $0x58] sm:$0xff] %vm136_vm1, %v128_v16 }
  0x96   :  { %147 = vst.msk [vmem:[%s363_s3 + $0x50] sm:$0xff] %vm136_vm1, %v127_v18 }
  0x99   :  { %v97_v19 = vpop.xlane.xlu0 %96  ;;  %v100_v23 = vpop.xlane.xlu1 %99 }
  0x9a   :  { %v103_v20 = vpop.xlane.xlu2 %102  ;;  %v129_v21 = vmul.f32 %v116_v58, %v97_v19  ;;  %v130_v24 = vmul.f32 %v116_v58, %v100_v23 }
  0x9b   :  { %v131_v22 = vmul.f32 %v116_v58, %v103_v20 }
  0x9c   :  { %149 = vst.msk [vmem:[%s363_s3 + $0x60] sm:$0xff] %vm136_vm1, %v129_v21 }
  0x9d   :  { %151 = vst.msk [vmem:[%s363_s3 + $0x70] sm:$0xff] %vm136_vm1, %v131_v22 }
  0x9e   :  { %150 = vst.msk [vmem:[%s363_s3 + $0x68] sm:$0xff] %vm136_vm1, %v130_v24 }
  0xa1   :  { %v106_v25 = vpop.xlane.xlu0 %105  ;;  %v109_v29 = vpop.xlane.xlu1 %108 }
  0xa2   :  { %v112_v26 = vpop.xlane.xlu2 %111  ;;  %v132_v27 = vmul.f32 %v116_v58, %v106_v25  ;;  %v133_v30 = vmul.f32 %v116_v58, %v109_v29 }
  0xa3   :  { %v134_v28 = vmul.f32 %v116_v58, %v112_v26 }
  0xa4   :  { %152 = vst.msk [vmem:[%s363_s3 + $0x78] sm:$0xff] %vm136_vm1, %v132_v27 }
  0xa5   :  { %154 = vst.msk [vmem:[%s363_s3 + $0x88] sm:$0xff] %vm136_vm1, %v134_v28 }
  0xa6   :  { %153 = vst.msk [vmem:[%s363_s3 + $0x80] sm:$0xff] %vm136_vm1, %v133_v30 }
  0xa9   :  { %v115_v31 = vpop.xlane.xlu0 %114 }
  0xaa   :  { %v135_v32 = vmul.f32 %v116_v58, %v115_v31 }
  0xac   :  { %155 = vst.msk [vmem:[%s363_s3 + $0x90] sm:$0xff] %vm136_vm1, %v135_v32 }

</bundles_post_ra>
